<compile_context>
chip_gen: v7x
topology: tpu7x:2x2x1
jax: 0.10.0
libtpu: 0.0.40
codegen_flags: <defaults>
</compile_context>

<pallas_src>
import jax
import jax.numpy as jnp
from jax.experimental import pallas as pl
from jax.experimental.pallas import tpu as pltpu

LANE = 128
SUBLANE = 8
NUM_CLASSES = 3


def _round_up(v, m):
    return (v + m - 1) // m * m


def pose_lstm_kernel(x_ref, wih_ref, bias_ref, whh_ref, wcls_ref, bcls_ref,
                     out_ref, xp_ref):
    # x_ref   : (T*Bp, Dp)  time-major, zero-padded input
    # wih_ref : (Dp, GP)    W_ih^T, gate-packed columns [i|f|o|g]
    # bias_ref: (1, GP)     b_ih + b_hh, gate-packed
    # whh_ref : (HP, GP)    W_hh^T, gate-packed, rows >= H are zero
    # wcls_ref: (HP, CP)    W_cls^T, rows >= H / cols >= C are zero
    # bcls_ref: (1, CP)
    # out_ref : (Bp, CP)
    # xp_ref  : (T*Bp, GP)  VMEM scratch: fused input projection
    TB, GP = xp_ref.shape
    Bp = out_ref.shape[0]
    T = TB // Bp
    H = GP // 4  # real hidden width (32); gates packed into one 128-lane group

    # --- Prologue (off the serial critical path): all time steps at once. ---
    xp_ref[...] = jnp.dot(x_ref[...], wih_ref[...],
                          preferred_element_type=jnp.float32) + bias_ref[...]

    whh = whh_ref[...]  # resident for the whole kernel

    # Lane-index masks, hoisted (JAX does not CSE broadcast_in_dim).
    lane = jax.lax.broadcasted_iota(jnp.int32, (Bp, GP), 1)
    sig_lanes = lane < 3 * H   # lanes [0, 96): i, f, o -> sigmoid; [96,128): g -> tanh
    h_lanes = lane < H         # real hidden lanes

    def step(t, carry):
        h, c = carry
        row = pl.multiple_of(t * Bp, Bp)
        # Only the truly sequential h @ W_hh^T stays on the critical path.
        gates = xp_ref[pl.ds(row, Bp), :] + jnp.dot(
            h, whh, preferred_element_type=jnp.float32)
        # One EUP pass for all four gates: sigmoid(x) = 0.5*(1 + tanh(x/2)).
        tpre = jnp.where(sig_lanes, 0.5 * gates, gates)
        tout = jnp.tanh(tpre)
        act = jnp.where(sig_lanes, 0.5 * (tout + 1.0), tout)
        # act lanes: [i | f | o | g]; align f, o, g onto the i/c lanes (XLU).
        f_al = pltpu.roll(act, GP - 1 * H, axis=1)  # f -> lanes [0, H)
        o_al = pltpu.roll(act, GP - 2 * H, axis=1)  # o -> lanes [0, H)
        g_al = pltpu.roll(act, GP - 3 * H, axis=1)  # g -> lanes [0, H)
        c_new = f_al * c + act * g_al
        h_new = o_al * jnp.tanh(c_new)
        # Keep padded hidden lanes exactly 0 (zero rows of W_hh^T/W_cls^T make
        # this exact anyway; the mask is one cheap VPU select for robustness).
        h_new = jnp.where(h_lanes, h_new, 0.0)
        return h_new, c_new

    h0 = jnp.zeros((Bp, GP), jnp.float32)
    c0 = jnp.zeros((Bp, GP), jnp.float32)
    h_last, _ = jax.lax.fori_loop(0, T, step, (h0, c0), unroll=True)

    # Lane-dense (128-wide) classifier output; real 3 classes sliced in wrapper.
    logits = jnp.dot(h_last, wcls_ref[...], preferred_element_type=jnp.float32)
    out_ref[...] = (logits + bcls_ref[...]).astype(out_ref.dtype)


def prepare_params(params):
    """One-time packing of weights into TPU-friendly layouts (not per-call)."""
    H = params["w_hh"].shape[1]
    D = params["w_ih"].shape[1]
    C = params["w_cls"].shape[0]
    # Gate-packed kernel assumes the 4 gates fill exactly one 128-lane group.
    # TODO(synk): generalize to H > 32 by per-gate lane padding (previous rev).
    assert 4 * H == LANE, "gate-packed kernel assumes 4*hidden_size == 128"
    f32 = jnp.float32
    Dp = _round_up(D, LANE)
    HP = LANE
    GP = 4 * H
    CP = LANE

    def pack_gate_cols(w):
        # PyTorch nn.LSTM row order is [i; f; g; o]; repack as columns [i|f|o|g].
        wi, wf, wg, wo = jnp.split(jnp.asarray(w, f32), 4, axis=0)   # (H, K) each
        return jnp.concatenate([wi, wf, wo, wg], axis=0).T           # (K, 4H)

    wih_p = jnp.zeros((Dp, GP), f32).at[:D, :].set(pack_gate_cols(params["w_ih"]))
    whh_p = jnp.zeros((HP, GP), f32).at[:H, :].set(pack_gate_cols(params["w_hh"]))

    b = (params["b_ih"] + params["b_hh"]).astype(f32)
    bi, bf, bg, bo = jnp.split(b, 4)
    bias_p = jnp.concatenate([bi, bf, bo, bg]).reshape(1, GP)

    wcls_p = jnp.zeros((HP, CP), f32).at[:H, :C].set(params["w_cls"].T.astype(f32))
    bcls_p = jnp.zeros((1, CP), f32).at[0, :C].set(params["b_cls"].astype(f32))

    return {"wih": wih_p, "whh": whh_p, "bias": bias_p,
            "wcls": wcls_p, "bcls": bcls_p}


@jax.jit
def pose_lstm_classifier(x, packed):
    """x: (B, T, D) float32 -> logits (B, 3). Single-layer batch-first LSTM."""
    B, T, D = x.shape
    Dp, GP = packed["wih"].shape
    CP = packed["bcls"].shape[1]
    Bp = _round_up(B, SUBLANE)
    f32 = jnp.float32

    # Layout plumbing only: time-major, batch/feature zero-padded input.
    x_tm = jnp.zeros((T, Bp, Dp), f32).at[:, :B, :D].set(
        jnp.transpose(x.astype(f32), (1, 0, 2))).reshape(T * Bp, Dp)

    out_pad = pl.pallas_call(
        pose_lstm_kernel,
        out_shape=jax.ShapeDtypeStruct((Bp, CP), f32),
        in_specs=[pl.BlockSpec(memory_space=pltpu.MemorySpace.VMEM)] * 6,
        out_specs=pl.BlockSpec(memory_space=pltpu.MemorySpace.VMEM),
        scratch_shapes=[pltpu.VMEM((T * Bp, GP), f32)],
    )(x_tm, packed["wih"], packed["bias"], packed["whh"],
      packed["wcls"], packed["bcls"])

    return out_pad[:B, :NUM_CLASSES]


def reference_forward(x, params):
    """Pure-JAX reference of the PyTorch forward (lax.scan LSTM)."""
    B, T, D = x.shape
    H = params["w_hh"].shape[1]
    w_ih_t = params["w_ih"].T
    w_hh_t = params["w_hh"].T
    bias = params["b_ih"] + params["b_hh"]

    def step(carry, x_t):
        h, c = carry
        gates = x_t @ w_ih_t + h @ w_hh_t + bias
        i = jax.nn.sigmoid(gates[:, 0 * H:1 * H])
        f = jax.nn.sigmoid(gates[:, 1 * H:2 * H])
        g = jnp.tanh(gates[:, 2 * H:3 * H])
        o = jax.nn.sigmoid(gates[:, 3 * H:4 * H])
        c_new = f * c + i * g
        h_new = o * jnp.tanh(c_new)
        return (h_new, c_new), None

    h0 = jnp.zeros((B, H), jnp.float32)
    c0 = jnp.zeros((B, H), jnp.float32)
    (h_last, _), _ = jax.lax.scan(step, (h0, c0), jnp.transpose(x, (1, 0, 2)))
    return h_last @ params["w_cls"].T + params["b_cls"]


def init_params(key, input_size, hidden_size, num_classes=NUM_CLASSES):
    # PyTorch default: uniform(-1/sqrt(H), 1/sqrt(H)) for LSTM and Linear params.
    k = 1.0 / jnp.sqrt(jnp.float32(hidden_size))
    keys = jax.random.split(key, 6)
    u = lambda kk, shape, lim: jax.random.uniform(kk, shape, jnp.float32, -lim, lim)
    return {
        "w_ih": u(keys[0], (4 * hidden_size, input_size), k),
        "w_hh": u(keys[1], (4 * hidden_size, hidden_size), k),
        "b_ih": u(keys[2], (4 * hidden_size,), k),
        "b_hh": u(keys[3], (4 * hidden_size,), k),
        "w_cls": u(keys[4], (num_classes, hidden_size), k),
        "b_cls": u(keys[5], (num_classes,), k),
    }


if __name__ == "__main__":
    B, T, D, H = 2, 8, 16, 32
    key = jax.random.PRNGKey(0)
    kx, kp = jax.random.split(key)
    x = jax.random.normal(kx, (B, T, D), jnp.float32)
    params = init_params(kp, D, H)

    packed = prepare_params(params)   # one-time weight packing, off the hot path
    logits = pose_lstm_classifier(x, packed)
    logits = jax.block_until_ready(logits)

    ref = reference_forward(x, params)
    assert logits.shape == (B, NUM_CLASSES)
    assert jnp.allclose(logits, ref, atol=1e-4, rtol=1e-4), (logits, ref)
    print("KERNEL_OK")
</pallas_src>

<mosaic_0001>
module attributes {stable_mosaic.version = 11 : i64} {
  func.func @pose_lstm_kernel(%arg0: memref<64x128xf32, #tpu.memory_space<vmem>>, %arg1: memref<128x128xf32, #tpu.memory_space<vmem>>, %arg2: memref<1x128xf32, #tpu.memory_space<vmem>>, %arg3: memref<128x128xf32, #tpu.memory_space<vmem>>, %arg4: memref<128x128xf32, #tpu.memory_space<vmem>>, %arg5: memref<1x128xf32, #tpu.memory_space<vmem>>, %arg6: memref<8x128xf32, #tpu.memory_space<vmem>>, %arg7: memref<64x128xf32, #tpu.memory_space<vmem>>) attributes {dimension_semantics = [], scalar_prefetch = 0 : i64, scratch_operands = 1 : i64, tpu.core_type = #tpu.core_type<tc>} {
    %c0 = arith.constant 0 : index
    %c0_0 = arith.constant 0 : index
    %0 = vector.load %arg0[%c0, %c0_0] : memref<64x128xf32, #tpu.memory_space<vmem>>, vector<64x128xf32>
    %c0_1 = arith.constant 0 : index
    %c0_2 = arith.constant 0 : index
    %1 = vector.load %arg1[%c0_1, %c0_2] : memref<128x128xf32, #tpu.memory_space<vmem>>, vector<128x128xf32>
    %cst = arith.constant dense<0.000000e+00> : vector<64x128xf32>
    %2 = tpu.matmul %0, %1, %cst {dimension_numbers = #tpu.dot_dimension_numbers<[1], [0], [0], [1], [0, 0, 1, 1], [], []>} : vector<64x128xf32>, vector<128x128xf32>, vector<64x128xf32> -> vector<64x128xf32>
    %c0_3 = arith.constant 0 : index
    %c0_4 = arith.constant 0 : index
    %3 = vector.load %arg2[%c0_3, %c0_4] : memref<1x128xf32, #tpu.memory_space<vmem>>, vector<1x128xf32>
    %4 = vector.broadcast %3 : vector<1x128xf32> to vector<64x128xf32>
    %5 = arith.addf %2, %4 : vector<64x128xf32>
    %c0_5 = arith.constant 0 : index
    %c0_6 = arith.constant 0 : index
    %6 = vector.load %arg7[%c0_5, %c0_6] : memref<64x128xf32, #tpu.memory_space<vmem>>, vector<64x128xf32>
    tpu.vector_store %arg7[%c0_5, %c0_6], %5 {strides = array<i32>} : memref<64x128xf32, #tpu.memory_space<vmem>>, vector<64x128xf32>,
    %c0_7 = arith.constant 0 : index
    %c0_8 = arith.constant 0 : index
    %7 = vector.load %arg3[%c0_7, %c0_8] : memref<128x128xf32, #tpu.memory_space<vmem>>, vector<128x128xf32>
    %8 = tpu.iota {dimensions = array<i32: 1>} : vector<8x128xi32>
    %c96_i32 = arith.constant 96 : i32
    %9 = vector.broadcast %c96_i32 : i32 to vector<8x128xi32>
    %10 = arith.cmpi slt, %8, %9 : vector<8x128xi32>
    %c32_i32 = arith.constant 32 : i32
    %11 = vector.broadcast %c32_i32 : i32 to vector<8x128xi32>
    %12 = arith.cmpi slt, %8, %11 : vector<8x128xi32>
    %cst_9 = arith.constant 0.000000e+00 : f32
    %13 = vector.broadcast %cst_9 : f32 to vector<8x128xf32>
    %cst_10 = arith.constant 0.000000e+00 : f32
    %14 = vector.broadcast %cst_10 : f32 to vector<8x128xf32>
    %c0_i32 = arith.constant 0 : i32
    %c8_i32 = arith.constant 8 : i32
    %15 = arith.muli %c0_i32, %c8_i32 : i32
    %16 = tpu.assume_multiple %15, 8 : i32
    %17 = arith.index_cast %16 : i32 to index
    %c0_11 = arith.constant 0 : index
    %18 = vector.load %arg7[%17, %c0_11] : memref<64x128xf32, #tpu.memory_space<vmem>>, vector<8x128xf32>
    %cst_12 = arith.constant dense<0.000000e+00> : vector<8x128xf32>
    %19 = tpu.matmul %13, %7, %cst_12 {dimension_numbers = #tpu.dot_dimension_numbers<[1], [0], [0], [1], [0, 0, 1, 1], [], []>} : vector<8x128xf32>, vector<128x128xf32>, vector<8x128xf32> -> vector<8x128xf32>
    %20 = arith.addf %18, %19 : vector<8x128xf32>
    %cst_13 = arith.constant 5.000000e-01 : f32
    %21 = vector.broadcast %cst_13 : f32 to vector<8x128xf32>
    %22 = arith.mulf %21, %20 : vector<8x128xf32>
    %23 = arith.select %10, %22, %20 : vector<8x128xi1>, vector<8x128xf32>
    %24 = math.tanh %23 : vector<8x128xf32>
    %cst_14 = arith.constant 1.000000e+00 : f32
    %25 = vector.broadcast %cst_14 : f32 to vector<8x128xf32>
    %26 = arith.addf %24, %25 : vector<8x128xf32>
    %cst_15 = arith.constant 5.000000e-01 : f32
    %27 = vector.broadcast %cst_15 : f32 to vector<8x128xf32>
    %28 = arith.mulf %27, %26 : vector<8x128xf32>
    %29 = arith.select %10, %28, %24 : vector<8x128xi1>, vector<8x128xf32>
    %c96_i32_16 = arith.constant 96 : i32
    %30 = tpu.dynamic_rotate %29 by %c96_i32_16 dim 1 : vector<8x128xf32>, i32 -> vector<8x128xf32>
    %c64_i32 = arith.constant 64 : i32
    %31 = tpu.dynamic_rotate %29 by %c64_i32 dim 1 : vector<8x128xf32>, i32 -> vector<8x128xf32>
    %c32_i32_17 = arith.constant 32 : i32
    %32 = tpu.dynamic_rotate %29 by %c32_i32_17 dim 1 : vector<8x128xf32>, i32 -> vector<8x128xf32>
    %33 = arith.mulf %30, %14 : vector<8x128xf32>
    %34 = arith.mulf %29, %32 : vector<8x128xf32>
    %35 = arith.addf %33, %34 : vector<8x128xf32>
    %36 = math.tanh %35 : vector<8x128xf32>
    %37 = arith.mulf %31, %36 : vector<8x128xf32>
    %cst_18 = arith.constant 0.000000e+00 : f32
    %38 = vector.broadcast %cst_18 : f32 to vector<8x128xf32>
    %39 = arith.select %12, %37, %38 : vector<8x128xi1>, vector<8x128xf32>
    %c1_i32 = arith.constant 1 : i32
    %c8_i32_19 = arith.constant 8 : i32
    %40 = arith.muli %c1_i32, %c8_i32_19 : i32
    %41 = tpu.assume_multiple %40, 8 : i32
    %42 = arith.index_cast %41 : i32 to index
    %c0_20 = arith.constant 0 : index
    %43 = vector.load %arg7[%42, %c0_20] : memref<64x128xf32, #tpu.memory_space<vmem>>, vector<8x128xf32>
    %cst_21 = arith.constant dense<0.000000e+00> : vector<8x128xf32>
    %44 = tpu.matmul %39, %7, %cst_21 {dimension_numbers = #tpu.dot_dimension_numbers<[1], [0], [0], [1], [0, 0, 1, 1], [], []>} : vector<8x128xf32>, vector<128x128xf32>, vector<8x128xf32> -> vector<8x128xf32>
    %45 = arith.addf %43, %44 : vector<8x128xf32>
    %cst_22 = arith.constant 5.000000e-01 : f32
    %46 = vector.broadcast %cst_22 : f32 to vector<8x128xf32>
    %47 = arith.mulf %46, %45 : vector<8x128xf32>
    %48 = arith.select %10, %47, %45 : vector<8x128xi1>, vector<8x128xf32>
    %49 = math.tanh %48 : vector<8x128xf32>
    %cst_23 = arith.constant 1.000000e+00 : f32
    %50 = vector.broadcast %cst_23 : f32 to vector<8x128xf32>
    %51 = arith.addf %49, %50 : vector<8x128xf32>
    %cst_24 = arith.constant 5.000000e-01 : f32
    %52 = vector.broadcast %cst_24 : f32 to vector<8x128xf32>
    %53 = arith.mulf %52, %51 : vector<8x128xf32>
    %54 = arith.select %10, %53, %49 : vector<8x128xi1>, vector<8x128xf32>
    %c96_i32_25 = arith.constant 96 : i32
    %55 = tpu.dynamic_rotate %54 by %c96_i32_25 dim 1 : vector<8x128xf32>, i32 -> vector<8x128xf32>
    %c64_i32_26 = arith.constant 64 : i32
    %56 = tpu.dynamic_rotate %54 by %c64_i32_26 dim 1 : vector<8x128xf32>, i32 -> vector<8x128xf32>
    %c32_i32_27 = arith.constant 32 : i32
    %57 = tpu.dynamic_rotate %54 by %c32_i32_27 dim 1 : vector<8x128xf32>, i32 -> vector<8x128xf32>
    %58 = arith.mulf %55, %35 : vector<8x128xf32>
    %59 = arith.mulf %54, %57 : vector<8x128xf32>
    %60 = arith.addf %58, %59 : vector<8x128xf32>
    %61 = math.tanh %60 : vector<8x128xf32>
    %62 = arith.mulf %56, %61 : vector<8x128xf32>
    %cst_28 = arith.constant 0.000000e+00 : f32
    %63 = vector.broadcast %cst_28 : f32 to vector<8x128xf32>
    %64 = arith.select %12, %62, %63 : vector<8x128xi1>, vector<8x128xf32>
    %c2_i32 = arith.constant 2 : i32
    %c8_i32_29 = arith.constant 8 : i32
    %65 = arith.muli %c2_i32, %c8_i32_29 : i32
    %66 = tpu.assume_multiple %65, 8 : i32
    %67 = arith.index_cast %66 : i32 to index
    %c0_30 = arith.constant 0 : index
    %68 = vector.load %arg7[%67, %c0_30] : memref<64x128xf32, #tpu.memory_space<vmem>>, vector<8x128xf32>
    %cst_31 = arith.constant dense<0.000000e+00> : vector<8x128xf32>
    %69 = tpu.matmul %64, %7, %cst_31 {dimension_numbers = #tpu.dot_dimension_numbers<[1], [0], [0], [1], [0, 0, 1, 1], [], []>} : vector<8x128xf32>, vector<128x128xf32>, vector<8x128xf32> -> vector<8x128xf32>
    %70 = arith.addf %68, %69 : vector<8x128xf32>
    %cst_32 = arith.constant 5.000000e-01 : f32
    %71 = vector.broadcast %cst_32 : f32 to vector<8x128xf32>
    %72 = arith.mulf %71, %70 : vector<8x128xf32>
    %73 = arith.select %10, %72, %70 : vector<8x128xi1>, vector<8x128xf32>
    %74 = math.tanh %73 : vector<8x128xf32>
    %cst_33 = arith.constant 1.000000e+00 : f32
    %75 = vector.broadcast %cst_33 : f32 to vector<8x128xf32>
    %76 = arith.addf %74, %75 : vector<8x128xf32>
    %cst_34 = arith.constant 5.000000e-01 : f32
    %77 = vector.broadcast %cst_34 : f32 to vector<8x128xf32>
    %78 = arith.mulf %77, %76 : vector<8x128xf32>
    %79 = arith.select %10, %78, %74 : vector<8x128xi1>, vector<8x128xf32>
    %c96_i32_35 = arith.constant 96 : i32
    %80 = tpu.dynamic_rotate %79 by %c96_i32_35 dim 1 : vector<8x128xf32>, i32 -> vector<8x128xf32>
    %c64_i32_36 = arith.constant 64 : i32
    %81 = tpu.dynamic_rotate %79 by %c64_i32_36 dim 1 : vector<8x128xf32>, i32 -> vector<8x128xf32>
    %c32_i32_37 = arith.constant 32 : i32
    %82 = tpu.dynamic_rotate %79 by %c32_i32_37 dim 1 : vector<8x128xf32>, i32 -> vector<8x128xf32>
    %83 = arith.mulf %80, %60 : vector<8x128xf32>
    %84 = arith.mulf %79, %82 : vector<8x128xf32>
    %85 = arith.addf %83, %84 : vector<8x128xf32>
    %86 = math.tanh %85 : vector<8x128xf32>
    %87 = arith.mulf %81, %86 : vector<8x128xf32>
    %cst_38 = arith.constant 0.000000e+00 : f32
    %88 = vector.broadcast %cst_38 : f32 to vector<8x128xf32>
    %89 = arith.select %12, %87, %88 : vector<8x128xi1>, vector<8x128xf32>
    %c3_i32 = arith.constant 3 : i32
    %c8_i32_39 = arith.constant 8 : i32
    %90 = arith.muli %c3_i32, %c8_i32_39 : i32
    %91 = tpu.assume_multiple %90, 8 : i32
    %92 = arith.index_cast %91 : i32 to index
    %c0_40 = arith.constant 0 : index
    %93 = vector.load %arg7[%92, %c0_40] : memref<64x128xf32, #tpu.memory_space<vmem>>, vector<8x128xf32>
    %cst_41 = arith.constant dense<0.000000e+00> : vector<8x128xf32>
    %94 = tpu.matmul %89, %7, %cst_41 {dimension_numbers = #tpu.dot_dimension_numbers<[1], [0], [0], [1], [0, 0, 1, 1], [], []>} : vector<8x128xf32>, vector<128x128xf32>, vector<8x128xf32> -> vector<8x128xf32>
    %95 = arith.addf %93, %94 : vector<8x128xf32>
    %cst_42 = arith.constant 5.000000e-01 : f32
    %96 = vector.broadcast %cst_42 : f32 to vector<8x128xf32>
    %97 = arith.mulf %96, %95 : vector<8x128xf32>
    %98 = arith.select %10, %97, %95 : vector<8x128xi1>, vector<8x128xf32>
    %99 = math.tanh %98 : vector<8x128xf32>
    %cst_43 = arith.constant 1.000000e+00 : f32
    %100 = vector.broadcast %cst_43 : f32 to vector<8x128xf32>
    %101 = arith.addf %99, %100 : vector<8x128xf32>
    %cst_44 = arith.constant 5.000000e-01 : f32
    %102 = vector.broadcast %cst_44 : f32 to vector<8x128xf32>
    %103 = arith.mulf %102, %101 : vector<8x128xf32>
    %104 = arith.select %10, %103, %99 : vector<8x128xi1>, vector<8x128xf32>
    %c96_i32_45 = arith.constant 96 : i32
    %105 = tpu.dynamic_rotate %104 by %c96_i32_45 dim 1 : vector<8x128xf32>, i32 -> vector<8x128xf32>
    %c64_i32_46 = arith.constant 64 : i32
    %106 = tpu.dynamic_rotate %104 by %c64_i32_46 dim 1 : vector<8x128xf32>, i32 -> vector<8x128xf32>
    %c32_i32_47 = arith.constant 32 : i32
    %107 = tpu.dynamic_rotate %104 by %c32_i32_47 dim 1 : vector<8x128xf32>, i32 -> vector<8x128xf32>
    %108 = arith.mulf %105, %85 : vector<8x128xf32>
    %109 = arith.mulf %104, %107 : vector<8x128xf32>
    %110 = arith.addf %108, %109 : vector<8x128xf32>
    %111 = math.tanh %110 : vector<8x128xf32>
    %112 = arith.mulf %106, %111 : vector<8x128xf32>
    %cst_48 = arith.constant 0.000000e+00 : f32
    %113 = vector.broadcast %cst_48 : f32 to vector<8x128xf32>
    %114 = arith.select %12, %112, %113 : vector<8x128xi1>, vector<8x128xf32>
    %c4_i32 = arith.constant 4 : i32
    %c8_i32_49 = arith.constant 8 : i32
    %115 = arith.muli %c4_i32, %c8_i32_49 : i32
    %116 = tpu.assume_multiple %115, 8 : i32
    %117 = arith.index_cast %116 : i32 to index
    %c0_50 = arith.constant 0 : index
    %118 = vector.load %arg7[%117, %c0_50] : memref<64x128xf32, #tpu.memory_space<vmem>>, vector<8x128xf32>
    %cst_51 = arith.constant dense<0.000000e+00> : vector<8x128xf32>
    %119 = tpu.matmul %114, %7, %cst_51 {dimension_numbers = #tpu.dot_dimension_numbers<[1], [0], [0], [1], [0, 0, 1, 1], [], []>} : vector<8x128xf32>, vector<128x128xf32>, vector<8x128xf32> -> vector<8x128xf32>
    %120 = arith.addf %118, %119 : vector<8x128xf32>
    %cst_52 = arith.constant 5.000000e-01 : f32
    %121 = vector.broadcast %cst_52 : f32 to vector<8x128xf32>
    %122 = arith.mulf %121, %120 : vector<8x128xf32>
    %123 = arith.select %10, %122, %120 : vector<8x128xi1>, vector<8x128xf32>
    %124 = math.tanh %123 : vector<8x128xf32>
    %cst_53 = arith.constant 1.000000e+00 : f32
    %125 = vector.broadcast %cst_53 : f32 to vector<8x128xf32>
    %126 = arith.addf %124, %125 : vector<8x128xf32>
    %cst_54 = arith.constant 5.000000e-01 : f32
    %127 = vector.broadcast %cst_54 : f32 to vector<8x128xf32>
    %128 = arith.mulf %127, %126 : vector<8x128xf32>
    %129 = arith.select %10, %128, %124 : vector<8x128xi1>, vector<8x128xf32>
    %c96_i32_55 = arith.constant 96 : i32
    %130 = tpu.dynamic_rotate %129 by %c96_i32_55 dim 1 : vector<8x128xf32>, i32 -> vector<8x128xf32>
    %c64_i32_56 = arith.constant 64 : i32
    %131 = tpu.dynamic_rotate %129 by %c64_i32_56 dim 1 : vector<8x128xf32>, i32 -> vector<8x128xf32>
    %c32_i32_57 = arith.constant 32 : i32
    %132 = tpu.dynamic_rotate %129 by %c32_i32_57 dim 1 : vector<8x128xf32>, i32 -> vector<8x128xf32>
    %133 = arith.mulf %130, %110 : vector<8x128xf32>
    %134 = arith.mulf %129, %132 : vector<8x128xf32>
    %135 = arith.addf %133, %134 : vector<8x128xf32>
    %136 = math.tanh %135 : vector<8x128xf32>
    %137 = arith.mulf %131, %136 : vector<8x128xf32>
    %cst_58 = arith.constant 0.000000e+00 : f32
    %138 = vector.broadcast %cst_58 : f32 to vector<8x128xf32>
    %139 = arith.select %12, %137, %138 : vector<8x128xi1>, vector<8x128xf32>
    %c5_i32 = arith.constant 5 : i32
    %c8_i32_59 = arith.constant 8 : i32
    %140 = arith.muli %c5_i32, %c8_i32_59 : i32
    %141 = tpu.assume_multiple %140, 8 : i32
    %142 = arith.index_cast %141 : i32 to index
    %c0_60 = arith.constant 0 : index
    %143 = vector.load %arg7[%142, %c0_60] : memref<64x128xf32, #tpu.memory_space<vmem>>, vector<8x128xf32>
    %cst_61 = arith.constant dense<0.000000e+00> : vector<8x128xf32>
    %144 = tpu.matmul %139, %7, %cst_61 {dimension_numbers = #tpu.dot_dimension_numbers<[1], [0], [0], [1], [0, 0, 1, 1], [], []>} : vector<8x128xf32>, vector<128x128xf32>, vector<8x128xf32> -> vector<8x128xf32>
    %145 = arith.addf %143, %144 : vector<8x128xf32>
    %cst_62 = arith.constant 5.000000e-01 : f32
    %146 = vector.broadcast %cst_62 : f32 to vector<8x128xf32>
    %147 = arith.mulf %146, %145 : vector<8x128xf32>
    %148 = arith.select %10, %147, %145 : vector<8x128xi1>, vector<8x128xf32>
    %149 = math.tanh %148 : vector<8x128xf32>
    %cst_63 = arith.constant 1.000000e+00 : f32
    %150 = vector.broadcast %cst_63 : f32 to vector<8x128xf32>
    %151 = arith.addf %149, %150 : vector<8x128xf32>
    %cst_64 = arith.constant 5.000000e-01 : f32
    %152 = vector.broadcast %cst_64 : f32 to vector<8x128xf32>
    %153 = arith.mulf %152, %151 : vector<8x128xf32>
    %154 = arith.select %10, %153, %149 : vector<8x128xi1>, vector<8x128xf32>
    %c96_i32_65 = arith.constant 96 : i32
    %155 = tpu.dynamic_rotate %154 by %c96_i32_65 dim 1 : vector<8x128xf32>, i32 -> vector<8x128xf32>
    %c64_i32_66 = arith.constant 64 : i32
    %156 = tpu.dynamic_rotate %154 by %c64_i32_66 dim 1 : vector<8x128xf32>, i32 -> vector<8x128xf32>
    %c32_i32_67 = arith.constant 32 : i32
    %157 = tpu.dynamic_rotate %154 by %c32_i32_67 dim 1 : vector<8x128xf32>, i32 -> vector<8x128xf32>
    %158 = arith.mulf %155, %135 : vector<8x128xf32>
    %159 = arith.mulf %154, %157 : vector<8x128xf32>
    %160 = arith.addf %158, %159 : vector<8x128xf32>
    %161 = math.tanh %160 : vector<8x128xf32>
    %162 = arith.mulf %156, %161 : vector<8x128xf32>
    %cst_68 = arith.constant 0.000000e+00 : f32
    %163 = vector.broadcast %cst_68 : f32 to vector<8x128xf32>
    %164 = arith.select %12, %162, %163 : vector<8x128xi1>, vector<8x128xf32>
    %c6_i32 = arith.constant 6 : i32
    %c8_i32_69 = arith.constant 8 : i32
    %165 = arith.muli %c6_i32, %c8_i32_69 : i32
    %166 = tpu.assume_multiple %165, 8 : i32
    %167 = arith.index_cast %166 : i32 to index
    %c0_70 = arith.constant 0 : index
    %168 = vector.load %arg7[%167, %c0_70] : memref<64x128xf32, #tpu.memory_space<vmem>>, vector<8x128xf32>
    %cst_71 = arith.constant dense<0.000000e+00> : vector<8x128xf32>
    %169 = tpu.matmul %164, %7, %cst_71 {dimension_numbers = #tpu.dot_dimension_numbers<[1], [0], [0], [1], [0, 0, 1, 1], [], []>} : vector<8x128xf32>, vector<128x128xf32>, vector<8x128xf32> -> vector<8x128xf32>
    %170 = arith.addf %168, %169 : vector<8x128xf32>
    %cst_72 = arith.constant 5.000000e-01 : f32
    %171 = vector.broadcast %cst_72 : f32 to vector<8x128xf32>
    %172 = arith.mulf %171, %170 : vector<8x128xf32>
    %173 = arith.select %10, %172, %170 : vector<8x128xi1>, vector<8x128xf32>
    %174 = math.tanh %173 : vector<8x128xf32>
    %cst_73 = arith.constant 1.000000e+00 : f32
    %175 = vector.broadcast %cst_73 : f32 to vector<8x128xf32>
    %176 = arith.addf %174, %175 : vector<8x128xf32>
    %cst_74 = arith.constant 5.000000e-01 : f32
    %177 = vector.broadcast %cst_74 : f32 to vector<8x128xf32>
    %178 = arith.mulf %177, %176 : vector<8x128xf32>
    %179 = arith.select %10, %178, %174 : vector<8x128xi1>, vector<8x128xf32>
    %c96_i32_75 = arith.constant 96 : i32
    %180 = tpu.dynamic_rotate %179 by %c96_i32_75 dim 1 : vector<8x128xf32>, i32 -> vector<8x128xf32>
    %c64_i32_76 = arith.constant 64 : i32
    %181 = tpu.dynamic_rotate %179 by %c64_i32_76 dim 1 : vector<8x128xf32>, i32 -> vector<8x128xf32>
    %c32_i32_77 = arith.constant 32 : i32
    %182 = tpu.dynamic_rotate %179 by %c32_i32_77 dim 1 : vector<8x128xf32>, i32 -> vector<8x128xf32>
    %183 = arith.mulf %180, %160 : vector<8x128xf32>
    %184 = arith.mulf %179, %182 : vector<8x128xf32>
    %185 = arith.addf %183, %184 : vector<8x128xf32>
    %186 = math.tanh %185 : vector<8x128xf32>
    %187 = arith.mulf %181, %186 : vector<8x128xf32>
    %cst_78 = arith.constant 0.000000e+00 : f32
    %188 = vector.broadcast %cst_78 : f32 to vector<8x128xf32>
    %189 = arith.select %12, %187, %188 : vector<8x128xi1>, vector<8x128xf32>
    %c7_i32 = arith.constant 7 : i32
    %c8_i32_79 = arith.constant 8 : i32
    %190 = arith.muli %c7_i32, %c8_i32_79 : i32
    %191 = tpu.assume_multiple %190, 8 : i32
    %192 = arith.index_cast %191 : i32 to index
    %c0_80 = arith.constant 0 : index
    %193 = vector.load %arg7[%192, %c0_80] : memref<64x128xf32, #tpu.memory_space<vmem>>, vector<8x128xf32>
    %cst_81 = arith.constant dense<0.000000e+00> : vector<8x128xf32>
    %194 = tpu.matmul %189, %7, %cst_81 {dimension_numbers = #tpu.dot_dimension_numbers<[1], [0], [0], [1], [0, 0, 1, 1], [], []>} : vector<8x128xf32>, vector<128x128xf32>, vector<8x128xf32> -> vector<8x128xf32>
    %195 = arith.addf %193, %194 : vector<8x128xf32>
    %cst_82 = arith.constant 5.000000e-01 : f32
    %196 = vector.broadcast %cst_82 : f32 to vector<8x128xf32>
    %197 = arith.mulf %196, %195 : vector<8x128xf32>
    %198 = arith.select %10, %197, %195 : vector<8x128xi1>, vector<8x128xf32>
    %199 = math.tanh %198 : vector<8x128xf32>
    %cst_83 = arith.constant 1.000000e+00 : f32
    %200 = vector.broadcast %cst_83 : f32 to vector<8x128xf32>
    %201 = arith.addf %199, %200 : vector<8x128xf32>
    %cst_84 = arith.constant 5.000000e-01 : f32
    %202 = vector.broadcast %cst_84 : f32 to vector<8x128xf32>
    %203 = arith.mulf %202, %201 : vector<8x128xf32>
    %204 = arith.select %10, %203, %199 : vector<8x128xi1>, vector<8x128xf32>
    %c96_i32_85 = arith.constant 96 : i32
    %205 = tpu.dynamic_rotate %204 by %c96_i32_85 dim 1 : vector<8x128xf32>, i32 -> vector<8x128xf32>
    %c64_i32_86 = arith.constant 64 : i32
    %206 = tpu.dynamic_rotate %204 by %c64_i32_86 dim 1 : vector<8x128xf32>, i32 -> vector<8x128xf32>
    %c32_i32_87 = arith.constant 32 : i32
    %207 = tpu.dynamic_rotate %204 by %c32_i32_87 dim 1 : vector<8x128xf32>, i32 -> vector<8x128xf32>
    %208 = arith.mulf %205, %185 : vector<8x128xf32>
    %209 = arith.mulf %204, %207 : vector<8x128xf32>
    %210 = arith.addf %208, %209 : vector<8x128xf32>
    %211 = math.tanh %210 : vector<8x128xf32>
    %212 = arith.mulf %206, %211 : vector<8x128xf32>
    %cst_88 = arith.constant 0.000000e+00 : f32
    %213 = vector.broadcast %cst_88 : f32 to vector<8x128xf32>
    %214 = arith.select %12, %212, %213 : vector<8x128xi1>, vector<8x128xf32>
    %c8_i32_89 = arith.constant 8 : i32
    %c0_90 = arith.constant 0 : index
    %c0_91 = arith.constant 0 : index
    %215 = vector.load %arg4[%c0_90, %c0_91] : memref<128x128xf32, #tpu.memory_space<vmem>>, vector<128x128xf32>
    %cst_92 = arith.constant dense<0.000000e+00> : vector<8x128xf32>
    %216 = tpu.matmul %214, %215, %cst_92 {dimension_numbers = #tpu.dot_dimension_numbers<[1], [0], [0], [1], [0, 0, 1, 1], [], []>} : vector<8x128xf32>, vector<128x128xf32>, vector<8x128xf32> -> vector<8x128xf32>
    %c0_93 = arith.constant 0 : index
    %c0_94 = arith.constant 0 : index
    %217 = vector.load %arg5[%c0_93, %c0_94] : memref<1x128xf32, #tpu.memory_space<vmem>>, vector<1x128xf32>
    %218 = vector.broadcast %217 : vector<1x128xf32> to vector<8x128xf32>
    %219 = arith.addf %216, %218 : vector<8x128xf32>
    %c0_95 = arith.constant 0 : index
    %c0_96 = arith.constant 0 : index
    %220 = vector.load %arg6[%c0_95, %c0_96] : memref<8x128xf32, #tpu.memory_space<vmem>>, vector<8x128xf32>
    tpu.vector_store %arg6[%c0_95, %c0_96], %219 {strides = array<i32>} : memref<8x128xf32, #tpu.memory_space<vmem>>, vector<8x128xf32>,
    return
  }
}

</mosaic_0001>

<bundles_post_ra>
// kernel: pose_lstm_classifier.1
= control target key start
LH: loop header
LB: loop body
LE: loop exit
PB: predicated region body
PF: predicated region fallthrough
CT: control target
= control target key end

     0   :  { %11 = vsyncpa [#allocation4], 0  ;;  %s2351_s0 = inlined_call_operand.vmem [shape: f32[64,128], index: 0, kind: input, shape index: {}]   ;;  %s2352_s1 = inlined_call_operand.vmem [shape: f32[128,128], index: 1, kind: input, shape index: {}]   ;;  %s2353_s2 = inlined_call_operand.vmem [shape: f32[1,128], index: 2, kind: input, shape index: {}]   ;;  %s2354_s3 = inlined_call_operand.hbm [shape: f32[128,128], index: 3, kind: input, shape index: {}]   ;;  %s2355_s4 = inlined_call_operand.hbm [shape: f32[128,128], index: 4, kind: input, shape index: {}]   ;;  %s2356_s5 = inlined_call_operand.vmem [shape: f32[1,128], index: 5, kind: input, shape index: {}]   ;;  %s2357_s6 = inlined_call_operand.vmem [shape: f32[8,128], index: 6, kind: output, shape index: {}]  }
   0x1   :  { %12 = vsyncpa [#allocation6], 0  ;;  %s1926_s21 = smov [#allocation3]   ;;  %s1878_s25 = scalar_lea.hbm %s2354_s3, 2048 }
   0x2   :  { %s24_s22 = sshll.u32 %s1926_s21, 4  ;;  %p1879_p0 = scmp.ne.s32.totalorder %s2354_s3, %s1878_s25  ;;  %s25_s22 = int_to_ptr.vmem [resolvable:$true] %s24_s22 }
   0x3   :  { %p1882_p1 = scmp.lt.u32.totalorder %s1878_s25, %s2354_s3 }
   0x5   :  { %p1884_p2 = pnand %p1882_p1, %p1879_p0 }
   0x7   :  { %1887 = shalt.err (!%p1884_p2)
}
   0x8   :  { %s1888_s30 = scalar_lea.vmem %s25_s22, 2048  ;;  %p1893_p4 = scmp.lt.s32.totalorder %s25_s22, %s25_s22 }
   0x9   :  { %p1889_p3 = scmp.ne.s32.totalorder %s25_s22, %s1888_s30  ;;  %p1894_p5 = scmp.lt.s32.totalorder %s1888_s30, %s1888_s30 }
   0xb   :  { %p1895_p6 = por %p1894_p5, %p1893_p4 }
   0xd   :  { %p1896_p7 = pnand %p1895_p6, %p1889_p3 }
   0xf   :  { %1899 = shalt.err (!%p1896_p7)
}
  0x10   :  { %s1927_s7 = smov 128   ;;  %s1928_s8 = smov 8  }
  0x11   :  { %30 = dma.hbm_to_vmem [thread:$0]  %s2354_s3, 2048, %s25_s22, [#allocation4], %s1927_s7, %s1927_s7, %s1928_s8  }
  0x12   :  { %s1929_s11 = smov [#allocation5]   ;;  %s1900_s15 = scalar_lea.hbm %s2355_s4, 2048 }
  0x13   :  { %s36_s12 = sshll.u32 %s1929_s11, 4  ;;  %p1901_p8 = scmp.ne.s32.totalorder %s2355_s4, %s1900_s15  ;;  %s37_s12 = int_to_ptr.vmem [resolvable:$true] %s36_s12 }
  0x14   :  { %p1904_p9 = scmp.lt.u32.totalorder %s1900_s15, %s2355_s4 }
  0x16   :  { %p1906_p10 = pnand %p1904_p9, %p1901_p8 }
  0x18   :  { %1909 = shalt.err (!%p1906_p10)
}
  0x19   :  { %s1910_s20 = scalar_lea.vmem %s37_s12, 2048  ;;  %p1915_p12 = scmp.lt.s32.totalorder %s37_s12, %s37_s12 }
  0x1a   :  { %p1911_p11 = scmp.ne.s32.totalorder %s37_s12, %s1910_s20  ;;  %p1916_p13 = scmp.lt.s32.totalorder %s1910_s20, %s1910_s20 }
  0x1c   :  { %p1917_p0 = por %p1916_p13, %p1915_p12 }
  0x1e   :  { %p1918_p1 = pnand %p1917_p0, %p1911_p11 }
  0x20   :  { %1921 = shalt.err (!%p1918_p1)
}
  0x21   :  { %42 = dma.hbm_to_vmem [thread:$0]  %s2355_s4, 2048, %s37_s12, [#allocation6], %s1927_s7, %s1927_s7, %s1928_s8  }
  0x22   :  { %1922 = dma.done.wait [#allocation4], 2048  }
  0x23   :  { %1923 = vsyncadd [#allocation4], 4294965248 }
  0x24   :  { %1924 = dma.done.wait [#allocation6], 2048  }
  0x25   :  { %1925 = vsyncadd [#allocation6], 4294965248  ;;  %v1930_v0 = vmov 0.0|0.0   ;;  %vm1931_vm0 = vmmov 0   ;;  %v1932_v1 = vmov 0.0   ;;  %v59_v2 = vld [vmem:[%s2352_s1] sm:$0xff]  ;;  %v211_v52 = vlaneseq }
  0x26   :  { %1620 = vmatprep.subr.bf16.mxu1 %v1930_v0  ;;  %1305 = vmatprep.mubr.msk.f32.mxu1 %vm1931_vm0, %v1932_v1  ;;  %v60_v3 = vld [vmem:[%s2352_s1 + $0x8] sm:$0xff]  ;;  %v195_v4 = vld [vmem:[#allocation3] sm:$0xff]  ;;  %v61_v7 = vld [vmem:[%s2352_s1 + $0x10] sm:$0xff]  ;;  %s1933_s15 = smov 64   ;;  %s1934_s16 = smov 96  }
  0x27   :  { %v1588_v5 = vpack.c.bf16 %v60_v3, %v59_v2  ;;  %v196_v6 = vld [vmem:[#allocation3 + $0x8] sm:$0xff]  ;;  %v62_v8 = vld [vmem:[%s2352_s1 + $0x18] sm:$0xff]  ;;  %v197_v11 = vld [vmem:[#allocation3 + $0x10] sm:$0xff]  ;;  %v2127_v57 = vand.u32 127, %v211_v52  ;;  %s1935_s3 = smov 32  }
  0x28   :  { %v2010_v9 = vpack.c.bf16 %v196_v6, %v195_v4  ;;  %v1592_v10 = vpack.c.bf16 %v62_v8, %v61_v7  ;;  %v198_v12 = vld [vmem:[#allocation3 + $0x18] sm:$0xff]  ;;  %v63_v13 = vld [vmem:[%s2352_s1 + $0x20] sm:$0xff]  ;;  %v64_v14 = vld [vmem:[%s2352_s1 + $0x28] sm:$0xff] }
  0x29   :  { %1589 = vmatprep.subr.bf16.mxu0 %v1588_v5  ;;  %v2019_v15 = vpack.c.bf16 %v198_v12, %v197_v11  ;;  %v1596_v16 = vpack.c.bf16 %v64_v14, %v63_v13  ;;  %v199_v17 = vld [vmem:[#allocation3 + $0x20] sm:$0xff]  ;;  %v200_v18 = vld [vmem:[#allocation3 + $0x28] sm:$0xff]  ;;  %v65_v19 = vld [vmem:[%s2352_s1 + $0x30] sm:$0xff]  ;;  %vm213_vm1 = vcmp.lt.s32.totalorder %v2127_v57, 96  ;;  %vm214_vm2 = vcmp.lt.s32.totalorder %v2127_v57, 32 }
  0x2a   :  { %1591 = vmatpush3.bf16.msra.mxu0 %v1588_v5  ;;  %1622 = vmatpush3.bf16.msra.mxu1 %v2010_v9  ;;  %v66_v20 = vld [vmem:[%s2352_s1 + $0x38] sm:$0xff]  ;;  %v2029_v21 = vpack.c.bf16 %v200_v18, %v199_v17  ;;  %v201_v23 = vld [vmem:[#allocation3 + $0x30] sm:$0xff]  ;;  %v67_v25 = vld [vmem:[%s2352_s1 + $0x40] sm:$0xff] }
  0x2b   :  { %1593 = vmatprep.subr.bf16.mxu0 %v1592_v10  ;;  %1623 = vmatprep.subr.bf16.mxu1 %v1930_v0  ;;  %v1600_v22 = vpack.c.bf16 %v66_v20, %v65_v19  ;;  %v202_v24 = vld [vmem:[#allocation3 + $0x38] sm:$0xff]  ;;  %v68_v26 = vld [vmem:[%s2352_s1 + $0x48] sm:$0xff]  ;;  %v51_v27 = vld [vmem:[%s2351_s0] sm:$0xff] }
  0x2c   :  { %1261 = vmatprep.mubr.f32.mxu0 %v51_v27  ;;  %v2042_v28 = vpack.c.bf16 %v202_v24, %v201_v23  ;;  %v1604_v29 = vpack.c.bf16 %v68_v26, %v67_v25  ;;  %v203_v30 = vld [vmem:[#allocation3 + $0x40] sm:$0xff]  ;;  %v204_v31 = vld [vmem:[#allocation3 + $0x48] sm:$0xff]  ;;  %v69_v32 = vld [vmem:[%s2352_s1 + $0x50] sm:$0xff] }
  0x2d   :  { %v70_v33 = vld [vmem:[%s2352_s1 + $0x58] sm:$0xff]  ;;  %v2052_v34 = vpack.c.bf16 %v204_v31, %v203_v30  ;;  %v205_v36 = vld [vmem:[#allocation3 + $0x50] sm:$0xff]  ;;  %v71_v38 = vld [vmem:[%s2352_s1 + $0x60] sm:$0xff] }
  0x2e   :  { %1595 = vmatpush3.bf16.msra.mxu0 %v1592_v10  ;;  %1625 = vmatpush3.bf16.msra.mxu1 %v2019_v15  ;;  %v1608_v35 = vpack.c.bf16 %v70_v33, %v69_v32  ;;  %v206_v37 = vld [vmem:[#allocation3 + $0x58] sm:$0xff]  ;;  %v72_v39 = vld [vmem:[%s2352_s1 + $0x68] sm:$0xff]  ;;  %v207_v42 = vld [vmem:[#allocation3 + $0x60] sm:$0xff] }
  0x2f   :  { %1597 = vmatprep.subr.bf16.mxu0 %v1596_v16  ;;  %1626 = vmatprep.subr.bf16.mxu1 %v1930_v0  ;;  %v2062_v40 = vpack.c.bf16 %v206_v37, %v205_v36  ;;  %v1612_v41 = vpack.c.bf16 %v72_v39, %v71_v38  ;;  %v208_v43 = vld [vmem:[#allocation3 + $0x68] sm:$0xff]  ;;  %v73_v44 = vld [vmem:[%s2352_s1 + $0x70] sm:$0xff]  ;;  %v74_v45 = vld [vmem:[%s2352_s1 + $0x78] sm:$0xff] }
  0x30   :  { %v2072_v46 = vpack.c.bf16 %v208_v43, %v207_v42  ;;  %v1616_v47 = vpack.c.bf16 %v74_v45, %v73_v44  ;;  %v209_v48 = vld [vmem:[#allocation3 + $0x70] sm:$0xff]  ;;  %v210_v49 = vld [vmem:[#allocation3 + $0x78] sm:$0xff]  ;;  %v52_v51 = vld [vmem:[%s2351_s0 + $0x8] sm:$0xff] }
  0x31   :  { %v2076_v50 = vpack.c.bf16 %v210_v49, %v209_v48  ;;  %v2123_v53 = vld [vmem:[%s2353_s2] ss:$0 sm:$0xff]  ;;  %v53_v63 = vld [vmem:[%s2351_s0 + $0x10] sm:$0xff]  ;;  %v54_v3 = vld [vmem:[%s2351_s0 + $0x18] sm:$0xff] }
  0x32   :  { %1599 = vmatpush3.bf16.msra.mxu0 %v1596_v16  ;;  %1628 = vmatpush3.bf16.msra.mxu1 %v2029_v21  ;;  %v55_v6 = vld [vmem:[%s2351_s0 + $0x20] sm:$0xff]  ;;  %v56_v7 = vld [vmem:[%s2351_s0 + $0x28] sm:$0xff]  ;;  %v57_v10 = vld [vmem:[%s2351_s0 + $0x30] sm:$0xff] }
  0x33   :  { %1601 = vmatprep.subr.bf16.mxu0 %v1600_v22  ;;  %1629 = vmatprep.subr.bf16.mxu1 %v1930_v0  ;;  %v58_v11 = vld [vmem:[%s2351_s0 + $0x38] sm:$0xff] }
  0x36   :  { %1603 = vmatpush3.bf16.msra.mxu0 %v1600_v22  ;;  %1631 = vmatpush3.bf16.msra.mxu1 %v2042_v28 }
  0x37   :  { %1605 = vmatprep.subr.bf16.mxu0 %v1604_v29  ;;  %1632 = vmatprep.subr.bf16.mxu1 %v1930_v0 }
  0x3a   :  { %1607 = vmatpush3.bf16.msra.mxu0 %v1604_v29  ;;  %1634 = vmatpush3.bf16.msra.mxu1 %v2052_v34 }
  0x3b   :  { %1609 = vmatprep.subr.bf16.mxu0 %v1608_v35  ;;  %1635 = vmatprep.subr.bf16.mxu1 %v1930_v0 }
  0x3e   :  { %1611 = vmatpush3.bf16.msra.mxu0 %v1608_v35  ;;  %1637 = vmatpush3.bf16.msra.mxu1 %v2062_v40 }
  0x3f   :  { %1613 = vmatprep.subr.bf16.mxu0 %v1612_v41  ;;  %1638 = vmatprep.subr.bf16.mxu1 %v1930_v0 }
  0x42   :  { %1615 = vmatpush3.bf16.msra.mxu0 %v1612_v41  ;;  %1640 = vmatpush3.bf16.msra.mxu1 %v2072_v46 }
  0x43   :  { %1617 = vmatprep.subr.bf16.mxu0 %v1616_v47  ;;  %1641 = vmatprep.subr.bf16.mxu1 %v1930_v0 }
  0x46   :  { %1619 = vmatpush3.bf16.msra.mxu0 %v1616_v47  ;;  %1643 = vmatpush3.bf16.msra.mxu1 %v2076_v50 }
  0x47   :  { %1644 = vmatprep.subr.bf16.mxu0 %v1930_v0  ;;  %1668 = vmatprep.subr.bf16.mxu1 %v1930_v0 }
  0x49   :  { %1262 = vmatmul.mubr.f32.vlgmr.msra.gmra.mrb[0].mxu0 %v52_v51  ;;  %1306 = vmatmul.mubr.f32.vlgmr.msra.gmra.mrb[0].mxu1 %v1932_v1 }
  0x4a   :  { %1646 = vmatpush3.bf16.msra.mxu0 %v2010_v9  ;;  %1670 = vmatpush3.bf16.msra.mxu1 %v2010_v9 }
  0x4b   :  { %1647 = vmatprep.subr.bf16.mxu0 %v1930_v0  ;;  %1671 = vmatprep.subr.bf16.mxu1 %v1930_v0 }
  0x4c   :  { %1375 = vmatprep.mubr.msk.f32.mxu1 %vm1931_vm0, %v1932_v1  ;;  %1264 = vmatprep.mubr.f32.mxu0 %v53_v63 }
  0x4d   :  { %1265 = vmatmul.mubr.f32.gmra.mrb[2].mxu0 %v54_v3 }
  0x4e   :  { %1649 = vmatpush3.bf16.msra.mxu0 %v2019_v15  ;;  %1673 = vmatpush3.bf16.msra.mxu1 %v2019_v15 }
  0x4f   :  { %1650 = vmatprep.subr.bf16.mxu0 %v1930_v0  ;;  %1674 = vmatprep.subr.bf16.mxu1 %v1930_v0 }
  0x50   :  { %1267 = vmatprep.mubr.f32.mxu0 %v55_v6 }
  0x51   :  { %1268 = vmatmul.mubr.f32.gmra.mrb[4].mxu0 %v56_v7 }
  0x52   :  { %1652 = vmatpush3.bf16.msra.mxu0 %v2029_v21  ;;  %1676 = vmatpush3.bf16.msra.mxu1 %v2029_v21 }
  0x53   :  { %1653 = vmatprep.subr.bf16.mxu0 %v1930_v0  ;;  %1677 = vmatprep.subr.bf16.mxu1 %v1930_v0 }
  0x54   :  { %1270 = vmatprep.mubr.f32.mxu0 %v57_v10 }
  0x55   :  { %1271 = vmatmul.mubr.f32.gmra.mrb[6].mxu0 %v58_v11 }
  0x56   :  { %1655 = vmatpush3.bf16.msra.mxu0 %v2042_v28  ;;  %1679 = vmatpush3.bf16.msra.mxu1 %v2042_v28 }
  0x57   :  { %1656 = vmatprep.subr.bf16.mxu0 %v1930_v0  ;;  %1680 = vmatprep.subr.bf16.mxu1 %v1930_v0 }
  0x58   :  { %1340 = vmatprep.mubr.msk.f32.mxu0 %vm1931_vm0, %v1932_v1 }
  0x5a   :  { %1658 = vmatpush3.bf16.msra.mxu0 %v2052_v34  ;;  %1682 = vmatpush3.bf16.msra.mxu1 %v2052_v34 }
  0x5b   :  { %1659 = vmatprep.subr.bf16.mxu0 %v1930_v0  ;;  %1683 = vmatprep.subr.bf16.mxu1 %v1930_v0 }
  0x5e   :  { %1661 = vmatpush3.bf16.msra.mxu0 %v2062_v40  ;;  %1685 = vmatpush3.bf16.msra.mxu1 %v2062_v40 }
  0x5f   :  { %1662 = vmatprep.subr.bf16.mxu0 %v1930_v0  ;;  %1686 = vmatprep.subr.bf16.mxu1 %v1930_v0 }
  0x62   :  { %1664 = vmatpush3.bf16.msra.mxu0 %v2072_v46  ;;  %1688 = vmatpush3.bf16.msra.mxu1 %v2072_v46 }
  0x63   :  { %1665 = vmatprep.subr.bf16.mxu0 %v1930_v0  ;;  %1689 = vmatprep.subr.bf16.mxu1 %v1930_v0 }
  0x66   :  { %1667 = vmatpush3.bf16.msra.mxu0 %v2076_v50  ;;  %1691 = vmatpush3.bf16.msra.mxu1 %v2076_v50 }
  0x67   :  { %1692 = vmatprep.subr.bf16.mxu0 %v1930_v0  ;;  %1716 = vmatprep.subr.bf16.mxu1 %v1930_v0 }
 0x11c   :  { %v2125_v54 = vpop.f32.mrb[0].mxu0  ;;  %v282_v55 = vpop.f32.mrb[0].mxu1 }
 0x11d   :  { %v148_v56 = vpop.f32.mrb[1].mxu0  ;;  %v1307_v58 = vpop.f32.mrb[1].mxu1  ;;  %v154_v29 = vadd.f32 %v2125_v54, %v2123_v53 }
 0x11e   :  { %v149_v59 = vadd.f32 %v2123_v53, %v148_v56 }
 0x120   :  { %v286_v60 = vadd.f32 %v282_v55, %v149_v59  ;;  %v2179_v22 = vpop.f32.mrb[2].mxu0 }
 0x121   :  { %v158_v23 = vpop.f32.mrb[3].mxu0  ;;  %v164_v10 = vadd.f32 %v2179_v22, %v2123_v53 }
 0x122   :  { %v287_v61 = vmul.f32 0.5, %v286_v60  ;;  %v159_v51 = vadd.f32 %v2123_v53, %v158_v23 }
 0x124   :  { %v288_v62 = vsel %vm213_vm1, %v287_v61, %v286_v60  ;;  %v2181_v24 = vpop.f32.mrb[4].mxu0 }
 0x125   :  { %1846 = vtanh.f32 %v288_v62  ;;  %v2183_v25 = vpop.f32.mrb[5].mxu0 }
 0x128   :  { %v2185_v26 = vpop.f32.mrb[6].mxu0 }
 0x129   :  { %v2187_v27 = vpop.f32.mrb[7].mxu0 }
 0x12f   :  { %v1847_v2 = vpop.eup %1846 }
 0x130   :  { %v290_v4 = vadd.f32 1.0, %v1847_v2 }
 0x132   :  { %v291_v5 = vmul.f32 0.5, %v290_v4 }
 0x134   :  { %v292_v8 = vsel %vm213_vm1, %v291_v5, %v1847_v2 }
 0x135   :  { %295 = vrot.lane.b32.xlu1 %v292_v8, %s1933_s15  ;;  %293 = vrot.lane.b32.xlu0 %v292_v8, %s1934_s16 }
 0x139   :  { %297 = vrot.lane.b32.xlu0 %v292_v8, %s1935_s3 }
 0x1a7   :  { %v294_v12 = vpop.permute.xlu0 %293  ;;  %v296_v19 = vpop.permute.xlu1 %295 }
 0x1a8   :  { %v299_v14 = vmul.f32 0.0, %v294_v12 }
 0x1ab   :  { %v298_v13 = vpop.permute.xlu0 %297 }
 0x1ac   :  { %v300_v16 = vmul.f32 %v298_v13, %v292_v8 }
 0x1ae   :  { %v301_v17 = vadd.f32 %v300_v16, %v299_v14 }
 0x1b0   :  { %1848 = vtanh.f32 %v301_v17 }
 0x1ba   :  { %v1849_v18 = vpop.eup %1848 }
 0x1bb   :  { %v303_v20 = vmul.f32 %v1849_v18, %v296_v19 }
 0x1bd   :  { %1341 = vmatmul.mubr.msk.f32.vlgmr.msra.gmra.mrb[8].mxu0 %vm214_vm2, %v303_v20 }
 0x1be   :  { %1694 = vmatpush3.bf16.msra.mxu0 %v2010_v9  ;;  %1410 = vmatprep.mubr.msk.f32.mxu0 %vm1931_vm0, %v1932_v1 }
 0x1bf   :  { %1695 = vmatprep.subr.bf16.mxu0 %v1930_v0 }
 0x1c2   :  { %1697 = vmatpush3.bf16.msra.mxu0 %v2019_v15 }
 0x1c3   :  { %1698 = vmatprep.subr.bf16.mxu0 %v1930_v0 }
 0x1c6   :  { %1700 = vmatpush3.bf16.msra.mxu0 %v2029_v21 }
 0x1c7   :  { %1701 = vmatprep.subr.bf16.mxu0 %v1930_v0 }
 0x1ca   :  { %1703 = vmatpush3.bf16.msra.mxu0 %v2042_v28 }
 0x1cb   :  { %1704 = vmatprep.subr.bf16.mxu0 %v1930_v0 }
 0x1ce   :  { %1706 = vmatpush3.bf16.msra.mxu0 %v2052_v34 }
 0x1cf   :  { %1707 = vmatprep.subr.bf16.mxu0 %v1930_v0 }
 0x1d2   :  { %1709 = vmatpush3.bf16.msra.mxu0 %v2062_v40 }
 0x1d3   :  { %1710 = vmatprep.subr.bf16.mxu0 %v1930_v0 }
 0x1d6   :  { %1712 = vmatpush3.bf16.msra.mxu0 %v2072_v46 }
 0x1d7   :  { %1713 = vmatprep.subr.bf16.mxu0 %v1930_v0 }
 0x1da   :  { %1715 = vmatpush3.bf16.msra.mxu0 %v2076_v50 }
 0x1db   :  { %1740 = vmatprep.subr.bf16.mxu0 %v1930_v0 }
 0x290   :  { %v373_v30 = vpop.f32.mrb[8].mxu0 }
 0x291   :  { %v377_v31 = vadd.f32 %v373_v30, %v154_v29  ;;  %v1342_v32 = vpop.f32.mrb[9].mxu0 }
 0x293   :  { %v378_v33 = vmul.f32 0.5, %v377_v31 }
 0x295   :  { %v379_v35 = vsel %vm213_vm1, %v378_v33, %v377_v31 }
 0x296   :  { %1850 = vtanh.f32 %v379_v35 }
 0x2a0   :  { %v1851_v36 = vpop.eup %1850 }
 0x2a1   :  { %v381_v37 = vadd.f32 1.0, %v1851_v36 }
 0x2a3   :  { %v382_v38 = vmul.f32 0.5, %v381_v37 }
 0x2a5   :  { %v383_v39 = vsel %vm213_vm1, %v382_v38, %v1851_v36  ;;  %v169_v36 = vadd.f32 %v2123_v53, %v2183_v25 }
 0x2a6   :  { %388 = vrot.lane.b32.xlu0 %v383_v39, %s1935_s3  ;;  %384 = vrot.lane.b32.xlu1 %v383_v39, %s1934_s16 }
 0x2aa   :  { %386 = vrot.lane.b32.xlu1 %v383_v39, %s1933_s15 }
 0x318   :  { %v389_v41 = vpop.permute.xlu0 %388  ;;  %v385_v42 = vpop.permute.xlu1 %384 }
 0x319   :  { %v391_v43 = vmul.f32 %v389_v41, %v383_v39  ;;  %v390_v44 = vmul.f32 %v385_v42, %v301_v17 }
 0x31b   :  { %v392_v45 = vadd.f32 %v391_v43, %v390_v44 }
 0x31c   :  { %v387_v48 = vpop.permute.xlu1 %386 }
 0x31d   :  { %1852 = vtanh.f32 %v392_v45 }
 0x327   :  { %v1853_v47 = vpop.eup %1852 }
 0x328   :  { %v394_v49 = vmul.f32 %v1853_v47, %v387_v48 }
 0x32a   :  { %1376 = vmatmul.mubr.msk.f32.vlgmr.msra.gmra.mrb[2].mxu1 %vm214_vm2, %v394_v49 }
 0x32b   :  { %1718 = vmatpush3.bf16.msra.mxu1 %v2010_v9  ;;  %1445 = vmatprep.mubr.msk.f32.mxu1 %vm1931_vm0, %v1932_v1 }
 0x32c   :  { %1719 = vmatprep.subr.bf16.mxu1 %v1930_v0 }
 0x32f   :  { %1721 = vmatpush3.bf16.msra.mxu1 %v2019_v15 }
 0x330   :  { %1722 = vmatprep.subr.bf16.mxu1 %v1930_v0 }
 0x333   :  { %1724 = vmatpush3.bf16.msra.mxu1 %v2029_v21 }
 0x334   :  { %1725 = vmatprep.subr.bf16.mxu1 %v1930_v0 }
 0x337   :  { %1727 = vmatpush3.bf16.msra.mxu1 %v2042_v28 }
 0x338   :  { %1728 = vmatprep.subr.bf16.mxu1 %v1930_v0 }
 0x33b   :  { %1730 = vmatpush3.bf16.msra.mxu1 %v2052_v34 }
 0x33c   :  { %1731 = vmatprep.subr.bf16.mxu1 %v1930_v0 }
 0x33f   :  { %1733 = vmatpush3.bf16.msra.mxu1 %v2062_v40 }
 0x340   :  { %1734 = vmatprep.subr.bf16.mxu1 %v1930_v0 }
 0x343   :  { %1736 = vmatpush3.bf16.msra.mxu1 %v2072_v46 }
 0x344   :  { %1737 = vmatprep.subr.bf16.mxu1 %v1930_v0 }
 0x347   :  { %1739 = vmatpush3.bf16.msra.mxu1 %v2076_v50 }
 0x348   :  { %1764 = vmatprep.subr.bf16.mxu1 %v1930_v0 }
 0x3fd   :  { %v464_v52 = vpop.f32.mrb[2].mxu1 }
 0x3fe   :  { %v468_v54 = vadd.f32 %v464_v52, %v159_v51  ;;  %v1377_v55 = vpop.f32.mrb[3].mxu1 }
 0x400   :  { %v469_v56 = vmul.f32 0.5, %v468_v54 }
 0x402   :  { %v470_v58 = vsel %vm213_vm1, %v469_v56, %v468_v54 }
 0x403   :  { %1854 = vtanh.f32 %v470_v58 }
 0x40d   :  { %v1855_v59 = vpop.eup %1854 }
 0x40e   :  { %v472_v60 = vadd.f32 1.0, %v1855_v59 }
 0x410   :  { %v473_v61 = vmul.f32 0.5, %v472_v60 }
 0x412   :  { %v474_v62 = vsel %vm213_vm1, %v473_v61, %v1855_v59 }
 0x413   :  { %479 = vrot.lane.b32.xlu1 %v474_v62, %s1935_s3  ;;  %475 = vrot.lane.b32.xlu0 %v474_v62, %s1934_s16 }
 0x417   :  { %477 = vrot.lane.b32.xlu0 %v474_v62, %s1933_s15 }
 0x485   :  { %v480_v63 = vpop.permute.xlu1 %479  ;;  %v476_v2 = vpop.permute.xlu0 %475 }
 0x486   :  { %v482_v3 = vmul.f32 %v480_v63, %v474_v62  ;;  %v481_v4 = vmul.f32 %v476_v2, %v392_v45 }
 0x488   :  { %v483_v5 = vadd.f32 %v482_v3, %v481_v4 }
 0x489   :  { %v478_v7 = vpop.permute.xlu0 %477 }
 0x48a   :  { %1856 = vtanh.f32 %v483_v5 }
 0x494   :  { %v1857_v6 = vpop.eup %1856 }
 0x495   :  { %v485_v8 = vmul.f32 %v1857_v6, %v478_v7 }
 0x497   :  { %1411 = vmatmul.mubr.msk.f32.vlgmr.msra.gmra.mrb[10].mxu0 %vm214_vm2, %v485_v8 }
 0x498   :  { %1742 = vmatpush3.bf16.msra.mxu0 %v2010_v9  ;;  %1480 = vmatprep.mubr.msk.f32.mxu0 %vm1931_vm0, %v1932_v1 }
 0x499   :  { %1743 = vmatprep.subr.bf16.mxu0 %v1930_v0 }
 0x49c   :  { %1745 = vmatpush3.bf16.msra.mxu0 %v2019_v15 }
 0x49d   :  { %1746 = vmatprep.subr.bf16.mxu0 %v1930_v0 }
 0x4a0   :  { %1748 = vmatpush3.bf16.msra.mxu0 %v2029_v21 }
 0x4a1   :  { %1749 = vmatprep.subr.bf16.mxu0 %v1930_v0 }
 0x4a4   :  { %1751 = vmatpush3.bf16.msra.mxu0 %v2042_v28 }
 0x4a5   :  { %1752 = vmatprep.subr.bf16.mxu0 %v1930_v0 }
 0x4a8   :  { %1754 = vmatpush3.bf16.msra.mxu0 %v2052_v34 }
 0x4a9   :  { %1755 = vmatprep.subr.bf16.mxu0 %v1930_v0 }
 0x4ac   :  { %1757 = vmatpush3.bf16.msra.mxu0 %v2062_v40 }
 0x4ad   :  { %1758 = vmatprep.subr.bf16.mxu0 %v1930_v0 }
 0x4b0   :  { %1760 = vmatpush3.bf16.msra.mxu0 %v2072_v46 }
 0x4b1   :  { %1761 = vmatprep.subr.bf16.mxu0 %v1930_v0 }
 0x4b4   :  { %1763 = vmatpush3.bf16.msra.mxu0 %v2076_v50 }
 0x4b5   :  { %1788 = vmatprep.subr.bf16.mxu0 %v1930_v0 }
 0x56a   :  { %v555_v11 = vpop.f32.mrb[10].mxu0 }
 0x56b   :  { %v559_v12 = vadd.f32 %v555_v11, %v164_v10  ;;  %v1412_v13 = vpop.f32.mrb[11].mxu0 }
 0x56d   :  { %v560_v14 = vmul.f32 0.5, %v559_v12 }
 0x56f   :  { %v561_v16 = vsel %vm213_vm1, %v560_v14, %v559_v12 }
 0x570   :  { %1858 = vtanh.f32 %v561_v16 }
 0x57a   :  { %v1859_v17 = vpop.eup %1858 }
 0x57b   :  { %v563_v18 = vadd.f32 1.0, %v1859_v17 }
 0x57d   :  { %v564_v19 = vmul.f32 0.5, %v563_v18 }
 0x57f   :  { %v565_v20 = vsel %vm213_vm1, %v564_v19, %v1859_v17 }
 0x580   :  { %570 = vrot.lane.b32.xlu0 %v565_v20, %s1935_s3  ;;  %566 = vrot.lane.b32.xlu1 %v565_v20, %s1934_s16 }
 0x584   :  { %568 = vrot.lane.b32.xlu1 %v565_v20, %s1933_s15 }
 0x5f2   :  { %v571_v22 = vpop.permute.xlu0 %570  ;;  %v567_v23 = vpop.permute.xlu1 %566 }
 0x5f3   :  { %v573_v29 = vmul.f32 %v571_v22, %v565_v20  ;;  %v572_v30 = vmul.f32 %v567_v23, %v483_v5  ;;  %v179_v5 = vadd.f32 %v2123_v53, %v2187_v27 }
 0x5f5   :  { %v574_v31 = vadd.f32 %v573_v29, %v572_v30  ;;  %v942_v29 = vld [vmem:[#allocation5] sm:$0xff]  ;;  %v943_v30 = vld [vmem:[#allocation5 + $0x8] sm:$0xff] }
 0x5f6   :  { %v569_v33 = vpop.permute.xlu1 %568 }
 0x5f7   :  { %1860 = vtanh.f32 %v574_v31 }
 0x601   :  { %v1861_v32 = vpop.eup %1860 }
 0x602   :  { %v576_v35 = vmul.f32 %v1861_v32, %v569_v33  ;;  %v1813_v32 = vpack.c.bf16 %v943_v30, %v942_v29  ;;  %v945_v33 = vld [vmem:[#allocation5 + $0x18] sm:$0xff] }
 0x604   :  { %1446 = vmatmul.mubr.msk.f32.vlgmr.msra.gmra.mrb[4].mxu1 %vm214_vm2, %v576_v35 }
 0x605   :  { %1766 = vmatpush3.bf16.msra.mxu1 %v2010_v9  ;;  %1515 = vmatprep.mubr.msk.f32.mxu1 %vm1931_vm0, %v1932_v1 }
 0x606   :  { %1767 = vmatprep.subr.bf16.mxu1 %v1930_v0 }
 0x609   :  { %1769 = vmatpush3.bf16.msra.mxu1 %v2019_v15 }
 0x60a   :  { %1770 = vmatprep.subr.bf16.mxu1 %v1930_v0 }
 0x60d   :  { %1772 = vmatpush3.bf16.msra.mxu1 %v2029_v21 }
 0x60e   :  { %1773 = vmatprep.subr.bf16.mxu1 %v1930_v0 }
 0x611   :  { %1775 = vmatpush3.bf16.msra.mxu1 %v2042_v28 }
 0x612   :  { %1776 = vmatprep.subr.bf16.mxu1 %v1930_v0 }
 0x615   :  { %1778 = vmatpush3.bf16.msra.mxu1 %v2052_v34 }
 0x616   :  { %1779 = vmatprep.subr.bf16.mxu1 %v1930_v0 }
 0x619   :  { %1781 = vmatpush3.bf16.msra.mxu1 %v2062_v40 }
 0x61a   :  { %1782 = vmatprep.subr.bf16.mxu1 %v1930_v0 }
 0x61d   :  { %1784 = vmatpush3.bf16.msra.mxu1 %v2072_v46 }
 0x61e   :  { %1785 = vmatprep.subr.bf16.mxu1 %v1930_v0 }
 0x621   :  { %1787 = vmatpush3.bf16.msra.mxu1 %v2076_v50 }
 0x622   :  { %1812 = vmatprep.subr.bf16.mxu1 %v1930_v0 }
 0x6d7   :  { %v646_v37 = vpop.f32.mrb[4].mxu1 }
 0x6d8   :  { %v650_v38 = vadd.f32 %v646_v37, %v169_v36  ;;  %v1447_v39 = vpop.f32.mrb[5].mxu1  ;;  %v946_v36 = vld [vmem:[#allocation5 + $0x20] sm:$0xff]  ;;  %v947_v37 = vld [vmem:[#allocation5 + $0x28] sm:$0xff] }
 0x6d9   :  { %v948_v39 = vld [vmem:[#allocation5 + $0x30] sm:$0xff] }
 0x6da   :  { %v651_v41 = vmul.f32 0.5, %v650_v38 }
 0x6dc   :  { %v652_v42 = vsel %vm213_vm1, %v651_v41, %v650_v38  ;;  %v1819_v38 = vpack.c.bf16 %v947_v37, %v946_v36  ;;  %v949_v41 = vld [vmem:[#allocation5 + $0x38] sm:$0xff] }
 0x6dd   :  { %1862 = vtanh.f32 %v652_v42  ;;  %v1822_v42 = vpack.c.bf16 %v949_v41, %v948_v39 }
 0x6e7   :  { %v1863_v43 = vpop.eup %1862 }
 0x6e8   :  { %v654_v44 = vadd.f32 1.0, %v1863_v43 }
 0x6ea   :  { %v655_v45 = vmul.f32 0.5, %v654_v44 }
 0x6ec   :  { %v656_v47 = vsel %vm213_vm1, %v655_v45, %v1863_v43  ;;  %v184_v43 = vadd.f32 %v2185_v26, %v2123_v53  ;;  %v955_v26 = vld [vmem:[#allocation5 + $0x68] sm:$0xff] }
 0x6ed   :  { %661 = vrot.lane.b32.xlu1 %v656_v47, %s1935_s3  ;;  %657 = vrot.lane.b32.xlu0 %v656_v47, %s1934_s16 }
 0x6f1   :  { %659 = vrot.lane.b32.xlu0 %v656_v47, %s1933_s15 }
 0x75f   :  { %v662_v25 = vpop.permute.xlu1 %661  ;;  %v658_v48 = vpop.permute.xlu0 %657 }
 0x760   :  { %v664_v49 = vmul.f32 %v662_v25, %v656_v47  ;;  %v663_v51 = vmul.f32 %v658_v48, %v574_v31  ;;  %v944_v31 = vld [vmem:[#allocation5 + $0x10] sm:$0xff] }
 0x761   :  { %v1816_v35 = vpack.c.bf16 %v945_v33, %v944_v31 }
 0x762   :  { %v665_v52 = vadd.f32 %v664_v49, %v663_v51  ;;  %v950_v49 = vld [vmem:[#allocation5 + $0x40] sm:$0xff]  ;;  %v951_v51 = vld [vmem:[#allocation5 + $0x48] sm:$0xff] }
 0x763   :  { %v660_v55 = vpop.permute.xlu0 %659 }
 0x764   :  { %1864 = vtanh.f32 %v665_v52 }
 0x76e   :  { %v1865_v54 = vpop.eup %1864 }
 0x76f   :  { %v667_v56 = vmul.f32 %v1865_v54, %v660_v55  ;;  %v952_v54 = vld [vmem:[#allocation5 + $0x50] sm:$0xff]  ;;  %v953_v55 = vld [vmem:[#allocation5 + $0x58] sm:$0xff] }
 0x771   :  { %1481 = vmatmul.mubr.msk.f32.vlgmr.msra.gmra.mrb[12].mxu0 %vm214_vm2, %v667_v56  ;;  %v1828_v56 = vpack.c.bf16 %v953_v55, %v952_v54 }
 0x772   :  { %1790 = vmatpush3.bf16.msra.mxu0 %v2010_v9  ;;  %1550 = vmatprep.mubr.msk.f32.mxu0 %vm1931_vm0, %v1932_v1  ;;  %v174_v9 = vadd.f32 %v2181_v24, %v2123_v53  ;;  %v954_v53 = vld [vmem:[#allocation5 + $0x60] sm:$0xff] }
 0x773   :  { %1791 = vmatprep.subr.bf16.mxu0 %v1930_v0 }
 0x776   :  { %1793 = vmatpush3.bf16.msra.mxu0 %v2019_v15 }
 0x777   :  { %1794 = vmatprep.subr.bf16.mxu0 %v1930_v0 }
 0x77a   :  { %1796 = vmatpush3.bf16.msra.mxu0 %v2029_v21 }
 0x77b   :  { %1797 = vmatprep.subr.bf16.mxu0 %v1930_v0 }
 0x77e   :  { %1799 = vmatpush3.bf16.msra.mxu0 %v2042_v28 }
 0x77f   :  { %1800 = vmatprep.subr.bf16.mxu0 %v1930_v0 }
 0x782   :  { %1802 = vmatpush3.bf16.msra.mxu0 %v2052_v34 }
 0x783   :  { %1803 = vmatprep.subr.bf16.mxu0 %v1930_v0 }
 0x786   :  { %1805 = vmatpush3.bf16.msra.mxu0 %v2062_v40 }
 0x787   :  { %1806 = vmatprep.subr.bf16.mxu0 %v1930_v0 }
 0x78a   :  { %1808 = vmatpush3.bf16.msra.mxu0 %v2072_v46 }
 0x78b   :  { %1809 = vmatprep.subr.bf16.mxu0 %v1930_v0 }
 0x78e   :  { %1811 = vmatpush3.bf16.msra.mxu0 %v2076_v50 }
 0x844   :  { %v737_v15 = vpop.f32.mrb[12].mxu0 }
 0x845   :  { %v741_v21 = vadd.f32 %v737_v15, %v174_v9  ;;  %v1482_v28 = vpop.f32.mrb[13].mxu0 }
 0x847   :  { %v742_v58 = vmul.f32 0.5, %v741_v21 }
 0x849   :  { %v743_v34 = vsel %vm213_vm1, %v742_v58, %v741_v21  ;;  %v1831_v21 = vpack.c.bf16 %v955_v26, %v954_v53  ;;  %v956_v58 = vld [vmem:[#allocation5 + $0x70] sm:$0xff] }
 0x84a   :  { %1866 = vtanh.f32 %v743_v34  ;;  %v957_v34 = vld [vmem:[#allocation5 + $0x78] sm:$0xff] }
 0x854   :  { %v1867_v40 = vpop.eup %1866 }
 0x855   :  { %v745_v59 = vadd.f32 1.0, %v1867_v40 }
 0x857   :  { %v746_v60 = vmul.f32 0.5, %v745_v59  ;;  %v1834_v59 = vpack.c.bf16 %v957_v34, %v956_v58 }
 0x859   :  { %v747_v46 = vsel %vm213_vm1, %v746_v60, %v1867_v40 }
 0x85a   :  { %752 = vrot.lane.b32.xlu0 %v747_v46, %s1935_s3  ;;  %748 = vrot.lane.b32.xlu1 %v747_v46, %s1934_s16 }
 0x85e   :  { %750 = vrot.lane.b32.xlu1 %v747_v46, %s1933_s15 }
 0x8cc   :  { %v753_v50 = vpop.permute.xlu0 %752  ;;  %v749_v24 = vpop.permute.xlu1 %748 }
 0x8cd   :  { %v755_v61 = vmul.f32 %v753_v50, %v747_v46  ;;  %v754_v62 = vmul.f32 %v749_v24, %v665_v52  ;;  %v1825_v52 = vpack.c.bf16 %v951_v51, %v950_v49 }
 0x8cf   :  { %v756_v63 = vadd.f32 %v755_v61, %v754_v62 }
 0x8d0   :  { %v751_v3 = vpop.permute.xlu1 %750 }
 0x8d1   :  { %1868 = vtanh.f32 %v756_v63 }
 0x8db   :  { %v1869_v2 = vpop.eup %1868 }
 0x8dc   :  { %v758_v4 = vmul.f32 %v1869_v2, %v751_v3  ;;  %v1050_v2 = vld [vmem:[%s2356_s5] ss:$0 sm:$0xff] }
 0x8de   :  { %1516 = vmatmul.mubr.msk.f32.vlgmr.msra.gmra.mrb[6].mxu1 %vm214_vm2, %v758_v4 }
 0x8df   :  { %1585 = vmatprep.mubr.msk.f32.mxu1 %vm1931_vm0, %v1932_v1  ;;  %1814 = vmatpush3.bf16.msra.mxu1 %v1813_v32 }
 0x8e0   :  { %1815 = vmatprep.subr.bf16.mxu1 %v1930_v0 }
 0x8e3   :  { %1817 = vmatpush3.bf16.msra.mxu1 %v1816_v35 }
 0x8e4   :  { %1818 = vmatprep.subr.bf16.mxu1 %v1930_v0 }
 0x8e7   :  { %1820 = vmatpush3.bf16.msra.mxu1 %v1819_v38 }
 0x8e8   :  { %1821 = vmatprep.subr.bf16.mxu1 %v1930_v0 }
 0x8eb   :  { %1823 = vmatpush3.bf16.msra.mxu1 %v1822_v42 }
 0x8ec   :  { %1824 = vmatprep.subr.bf16.mxu1 %v1930_v0 }
 0x8ef   :  { %1826 = vmatpush3.bf16.msra.mxu1 %v1825_v52 }
 0x8f0   :  { %1827 = vmatprep.subr.bf16.mxu1 %v1930_v0 }
 0x8f3   :  { %1829 = vmatpush3.bf16.msra.mxu1 %v1828_v56 }
 0x8f4   :  { %1830 = vmatprep.subr.bf16.mxu1 %v1930_v0 }
 0x8f7   :  { %1832 = vmatpush3.bf16.msra.mxu1 %v1831_v21 }
 0x8f8   :  { %1833 = vmatprep.subr.bf16.mxu1 %v1930_v0 }
 0x8fb   :  { %1835 = vmatpush3.bf16.msra.mxu1 %v1834_v59 }
 0x9b1   :  { %v828_v6 = vpop.f32.mrb[6].mxu1 }
 0x9b2   :  { %v832_v7 = vadd.f32 %v828_v6, %v179_v5  ;;  %v1517_v8 = vpop.f32.mrb[7].mxu1 }
 0x9b4   :  { %v833_v10 = vmul.f32 0.5, %v832_v7 }
 0x9b6   :  { %v834_v11 = vsel %vm213_vm1, %v833_v10, %v832_v7 }
 0x9b7   :  { %1870 = vtanh.f32 %v834_v11 }
 0x9c1   :  { %v1871_v12 = vpop.eup %1870 }
 0x9c2   :  { %v836_v13 = vadd.f32 1.0, %v1871_v12 }
 0x9c4   :  { %v837_v14 = vmul.f32 0.5, %v836_v13 }
 0x9c6   :  { %v838_v16 = vsel %vm213_vm1, %v837_v14, %v1871_v12 }
 0x9c7   :  { %843 = vrot.lane.b32.xlu1 %v838_v16, %s1935_s3  ;;  %839 = vrot.lane.b32.xlu0 %v838_v16, %s1934_s16 }
 0x9cb   :  { %841 = vrot.lane.b32.xlu0 %v838_v16, %s1933_s15 }
 0xa39   :  { %v844_v1 = vpop.permute.xlu1 %843  ;;  %v840_v27 = vpop.permute.xlu0 %839 }
 0xa3a   :  { %v846_v17 = vmul.f32 %v844_v1, %v838_v16  ;;  %v845_v18 = vmul.f32 %v840_v27, %v756_v63 }
 0xa3c   :  { %v847_v19 = vadd.f32 %v846_v17, %v845_v18 }
 0xa3d   :  { %v842_v22 = vpop.permute.xlu0 %841 }
 0xa3e   :  { %1872 = vtanh.f32 %v847_v19 }
 0xa48   :  { %v1873_v20 = vpop.eup %1872 }
 0xa49   :  { %v849_v23 = vmul.f32 %v1873_v20, %v842_v22 }
 0xa4b   :  { %1551 = vmatmul.mubr.msk.f32.vlgmr.msra.gmra.mrb[14].mxu0 %vm214_vm2, %v849_v23 }
 0xb1e   :  { %v919_v44 = vpop.f32.mrb[14].mxu0 }
 0xb1f   :  { %v923_v45 = vadd.f32 %v919_v44, %v184_v43  ;;  %v1552_v47 = vpop.f32.mrb[15].mxu0 }
 0xb21   :  { %v924_v25 = vmul.f32 0.5, %v923_v45 }
 0xb23   :  { %v925_v48 = vsel %vm213_vm1, %v924_v25, %v923_v45 }
 0xb24   :  { %1874 = vtanh.f32 %v925_v48 }
 0xb2e   :  { %v1875_v9 = vpop.eup %1874 }
 0xb2f   :  { %v927_v15 = vadd.f32 1.0, %v1875_v9 }
 0xb31   :  { %v928_v28 = vmul.f32 0.5, %v927_v15 }
 0xb33   :  { %v929_v40 = vsel %vm213_vm1, %v928_v28, %v1875_v9 }
 0xb34   :  { %934 = vrot.lane.b32.xlu0 %v929_v40, %s1935_s3  ;;  %930 = vrot.lane.b32.xlu1 %v929_v40, %s1934_s16 }
 0xb38   :  { %932 = vrot.lane.b32.xlu1 %v929_v40, %s1933_s15 }
 0xba6   :  { %v935_v60 = vpop.permute.xlu0 %934  ;;  %v931_v46 = vpop.permute.xlu1 %930 }
 0xba7   :  { %v937_v50 = vmul.f32 %v935_v60, %v929_v40  ;;  %v936_v24 = vmul.f32 %v931_v46, %v847_v19 }
 0xba9   :  { %v938_v61 = vadd.f32 %v937_v50, %v936_v24 }
 0xbaa   :  { %v933_v62 = vpop.permute.xlu1 %932 }
 0xbab   :  { %1876 = vtanh.f32 %v938_v61 }
 0xbb5   :  { %v1877_v0 = vpop.eup %1876 }
 0xbb6   :  { %v940_v63 = vmul.f32 %v1877_v0, %v933_v62 }
 0xbb8   :  { %1586 = vmatmul.mubr.msk.f32.vlgmr.msra.gmra.mrb[8].mxu1 %vm214_vm2, %v940_v63 }
 0xc8b   :  { %v1031_v3 = vpop.f32.mrb[8].mxu1 }
 0xc8c   :  { %v1032_v4 = vadd.f32 %v1050_v2, %v1031_v3  ;;  %v1587_v5 = vpop.f32.mrb[9].mxu1 }
 0xc8e   :  { %1035 = vst [vmem:[%s2357_s6] sm:$0xff] %v1032_v4 }
 0xc8f   :  { %1040 = vsyncpa [#allocation4], 1 }
 0xc90   :  { %1041 = vsyncpa [#allocation6], 1 }

</bundles_post_ra>
